<compile_context>
chip_gen: v6e
topology: v6e:2x2x1
jax: 0.10.0
libtpu: 0.0.40
codegen_flags: <defaults>
</compile_context>

<pallas_src>
import functools

import jax
import jax.numpy as jnp
from jax.experimental import pallas as pl
from jax.experimental.pallas import tpu as pltpu


# ----------------------------- kernels ---------------------------------------


def _fused_kernel(x_ref, w1t_ref, b1_ref, w2_ref, b2_ref, o_ref):
    """Single pass: pooled sum -> SE-MLP -> sigmoid -> rescale, one image/step.

    x_ref  : (1, C, HW)  whole image resident in VMEM
    w1t_ref: (C, Cr)     first 1x1 conv weight, transposed, 1/HW pre-folded
    b1_ref : (1, Cr)     w2_ref: (C, Cr)     b2_ref: (C, 1)
    o_ref  : (1, C, HW)
    """
    x = x_ref[0]                                                     # (C, HW)
    # Channel sums in f32 (w1t already carries the 1/HW of the average pool).
    y = jnp.sum(x.astype(jnp.float32), axis=1, keepdims=True)        # (C, 1)
    # Squeeze-excite MLP as VPU broadcast-mul + reduce (avoids an f32 MXU
    # matvec that only uses one MXU column and is multi-pass on v7x).
    h = jnp.sum(w1t_ref[...] * y, axis=0, keepdims=True) + b1_ref[...]   # (1, Cr)
    h = jnp.maximum(h, 0.0)
    z = jnp.sum(w2_ref[...] * h, axis=1, keepdims=True) + b2_ref[...]    # (C, 1)
    s = jax.nn.sigmoid(z)                                            # (C, 1) f32
    o_ref[0] = x * s.astype(o_ref.dtype)


def _pool_partial_kernel(x_ref, psum_ref, *, hw, tile):
    """Pass 1: per-tile partial channel sums, folded to 128 lanes (VPU only).

    x_ref   : (1, C, T)       lane-dense spatial tile (last tile may be ragged)
    psum_ref: (1, 1, C, 128)  f32 partial sums for this (image, tile)
    """
    xv = x_ref[0].astype(jnp.float32)                                # (C, T)
    if hw % tile != 0:
        # Mask the out-of-bounds lanes of the ragged final tile (OOB contents
        # of the VMEM block are unspecified).
        t = pl.program_id(1)
        lane = jax.lax.broadcasted_iota(jnp.int32, xv.shape, 1)
        xv = jnp.where(t * tile + lane < hw, xv, 0.0)
    # Reduce-late: fold T lanes down to 128 with elementwise adds of static,
    # 128-aligned lane slices (free vreg selects + VALU, which has slack on a
    # memory-bound pass).  The final 128 -> 1 reduce happens in plain JAX.
    acc = xv[:, 0:128]
    for k in range(1, tile // 128):
        acc = acc + xv[:, k * 128:(k + 1) * 128]
    psum_ref[0, 0] = acc


def _rescale_kernel(s_ref, x_ref, o_ref):
    """Pass 2: out = x * scale over lane-dense HW tiles (input-dtype math)."""
    o_ref[0] = x_ref[0] * s_ref[0].astype(o_ref.dtype)


# ----------------------------- wrapper ----------------------------------------


def _vmem_capacity_bytes():
    try:
        info = pltpu.get_tpu_info()
        cap = int(getattr(info, "vmem_capacity_bytes", 0) or 0)
    except Exception:
        cap = 0
    if cap <= 0:
        cap = 64 * 1024 * 1024      # conservative default (v7x per-core VMEM)
    return cap


def _choose_hw_tile(C, HW, itemsize, target_bytes=2 * 1024 * 1024):
    """Lane-dense HW tile: multiple of 128, ~target_bytes, divisor-snapped."""
    hw_lane = pl.cdiv(HW, 128) * 128
    lanes = max(128, ((target_bytes // max(1, C * itemsize)) // 128) * 128)
    lanes = min(lanes, hw_lane, 128 * 128)    # also caps the lane-fold unroll
    # Snap down to a tile that divides the 128-aligned extent so every DMA is
    # full-size (no ragged tile) whenever HW itself is a multiple of 128.
    n128 = hw_lane // 128
    for d in range(lanes // 128, 0, -1):
        if n128 % d == 0:
            return d * 128
    return 128


def ca_layer(x, w1, b1, w2, b2, *, single_pass=None, hw_tile=None, donate_x=False):
    """Channel attention: x * sigmoid(W2 @ relu(W1 @ avgpool(x) + b1) + b2).

    x : (N, C, H, W);  w1: (Cr, C);  b1: (Cr,);  w2: (C, Cr);  b2: (C,)

    single_pass: None = auto (per-chip VMEM gate), True/False forces a path.
    hw_tile    : optional override of the streaming HW tile (multiple of 128).
    donate_x   : set only when the caller donates x (jit donate_argnums) so the
                 output HBM buffer can alias x.
    """
    N, C, H, W = x.shape
    Cr = w1.shape[0]
    HW = H * W
    itemsize = jnp.dtype(x.dtype).itemsize

    x2 = x.reshape(N, C, HW)          # collapses the two minor dims; no copy

    cap = _vmem_capacity_bytes()
    vmem_limit = max(16 * 1024 * 1024, min(int(cap * 0.7), 100 * 1024 * 1024))

    w1f = w1.astype(jnp.float32)
    b1f = b1.astype(jnp.float32)
    w2f = w2.astype(jnp.float32)
    b2f = b2.astype(jnp.float32)

    # ---------------- fused single-pass path (x read from HBM once) ----------
    slab = C * HW
    # in + out double-buffered across the N grid steps, plus an f32 temp slab.
    fused_need = slab * (4 * itemsize + 4) + 4 * C * (Cr + 2) * 4
    use_fused = single_pass if single_pass is not None else (
        fused_need <= int(cap * 0.5))

    if use_fused:
        w1t = (w1f / float(HW)).T                    # (C, Cr), 1/HW folded in
        b1r = b1f.reshape(1, Cr)
        b2c = b2f.reshape(C, 1)
        cost = pl.CostEstimate(
            flops=N * (2 * C * HW + 4 * C * Cr),
            transcendentals=N * C,
            bytes_accessed=2 * N * C * HW * itemsize,
        )
        out = pl.pallas_call(
            _fused_kernel,
            out_shape=jax.ShapeDtypeStruct((N, C, HW), x.dtype),
            grid_spec=pltpu.PrefetchScalarGridSpec(
                num_scalar_prefetch=0,
                grid=(N,),
                in_specs=[
                    pl.BlockSpec((1, C, HW), lambda n: (n, 0, 0)),
                    pl.BlockSpec((C, Cr), lambda n: (0, 0)),
                    pl.BlockSpec((1, Cr), lambda n: (0, 0)),
                    pl.BlockSpec((C, Cr), lambda n: (0, 0)),
                    pl.BlockSpec((C, 1), lambda n: (0, 0)),
                ],
                out_specs=pl.BlockSpec((1, C, HW), lambda n: (n, 0, 0)),
            ),
            compiler_params=pltpu.CompilerParams(
                dimension_semantics=("parallel",),
                vmem_limit_bytes=vmem_limit),
            cost_estimate=cost,
            input_output_aliases=({0: 0} if donate_x else {}),
        )(x2, w1t, b1r, w2f, b2c)
        return out.reshape(N, C, H, W)

    # ---------------- two-pass streaming path --------------------------------
    T = hw_tile if hw_tile is not None else _choose_hw_tile(C, HW, itemsize)
    assert T % 128 == 0, "hw_tile must be a multiple of 128"
    n_tiles = pl.cdiv(HW, T)

    # pass 1: per-tile partial sums (both grid axes parallel -> megacore-able)
    pool_cost = pl.CostEstimate(
        flops=N * C * HW,
        transcendentals=0,
        bytes_accessed=N * C * HW * itemsize + N * n_tiles * C * 128 * 4,
    )
    psums = pl.pallas_call(
        functools.partial(_pool_partial_kernel, hw=HW, tile=T),
        out_shape=jax.ShapeDtypeStruct((N, n_tiles, C, 128), jnp.float32),
        grid_spec=pltpu.PrefetchScalarGridSpec(
            num_scalar_prefetch=0,
            grid=(N, n_tiles),
            in_specs=[pl.BlockSpec((1, C, T), lambda n, t: (n, 0, t))],
            out_specs=pl.BlockSpec((1, 1, C, 128), lambda n, t: (n, t, 0, 0)),
        ),
        compiler_params=pltpu.CompilerParams(
            dimension_semantics=("parallel", "parallel"),
            vmem_limit_bytes=vmem_limit),
        cost_estimate=pool_cost,
    )(x2)

    # Tiny squeeze-excite MLP + sigmoid in plain JAX (only N*C floats); keeps
    # the f32 matvecs out of the streaming kernels' critical path.
    sums = jnp.sum(psums, axis=(1, 3))                     # (N, C) f32
    y = sums * (1.0 / float(HW))
    h = jnp.maximum(y @ w1f.T + b1f[None, :], 0.0)         # (N, Cr)
    z = h @ w2f.T + b2f[None, :]                           # (N, C)
    scales = jax.nn.sigmoid(z)[:, :, None]                 # (N, C, 1) f32

    # pass 2: out = x * scale, fully parallel streaming (ragged tail handled by
    # discarded OOB output lanes; no masking needed).
    rescale_cost = pl.CostEstimate(
        flops=N * C * HW,
        transcendentals=0,
        bytes_accessed=2 * N * C * HW * itemsize + N * C * 4,
    )
    out = pl.pallas_call(
        _rescale_kernel,
        out_shape=jax.ShapeDtypeStruct((N, C, HW), x.dtype),
        grid_spec=pltpu.PrefetchScalarGridSpec(
            num_scalar_prefetch=0,
            grid=(N, n_tiles),
            in_specs=[
                pl.BlockSpec((1, C, 1), lambda n, t: (n, 0, 0)),
                pl.BlockSpec((1, C, T), lambda n, t: (n, 0, t)),
            ],
            out_specs=pl.BlockSpec((1, C, T), lambda n, t: (n, 0, t)),
        ),
        compiler_params=pltpu.CompilerParams(
            dimension_semantics=("parallel", "parallel"),
            vmem_limit_bytes=vmem_limit),
        cost_estimate=rescale_cost,
        input_output_aliases=({1: 0} if donate_x else {}),
    )(scales, x2)

    return out.reshape(N, C, H, W)


def ca_layer_ref(x, w1, b1, w2, b2):
    """Pure-JAX reference matching the PyTorch module."""
    y = jnp.mean(x, axis=(2, 3), keepdims=True)               # (N, C, 1, 1)
    y = jnp.einsum('oc,ncij->noij', w1, y) + b1[None, :, None, None]
    y = jnp.maximum(y, 0.0)
    y = jnp.einsum('oc,ncij->noij', w2, y) + b2[None, :, None, None]
    return x * jax.nn.sigmoid(y)


if __name__ == "__main__":
    def make(N, C, H, W, reduction):
        Cr = max(1, C // reduction)
        k = jax.random.split(jax.random.PRNGKey(0), 5)
        x = jax.random.normal(k[0], (N, C, H, W), dtype=jnp.float32)
        w1 = jax.random.normal(k[1], (Cr, C), dtype=jnp.float32) * 0.1
        b1 = jax.random.normal(k[2], (Cr,), dtype=jnp.float32) * 0.1
        w2 = jax.random.normal(k[3], (C, Cr), dtype=jnp.float32) * 0.1
        b2 = jax.random.normal(k[4], (C,), dtype=jnp.float32) * 0.1
        return x, w1, b1, w2, b2

    # Case 1: RFSR-style channels, small spatial -> exercises the fused path.
    x, w1, b1, w2, b2 = make(2, 64, 8, 8, 16)
    ref = ca_layer_ref(x, w1, b1, w2, b2)
    out = jax.block_until_ready(ca_layer(x, w1, b1, w2, b2))
    assert out.shape == x.shape
    assert jnp.allclose(out, ref, atol=1e-5, rtol=1e-5), "fused path mismatch"

    # Same inputs through the two-pass streaming path (ragged tile: HW=64<128).
    out2 = jax.block_until_ready(ca_layer(x, w1, b1, w2, b2, single_pass=False))
    assert jnp.allclose(out2, ref, atol=1e-5, rtol=1e-5), "two-pass (ragged) mismatch"

    # Case 2: two-pass path with multiple, evenly-dividing HW tiles.
    x, w1, b1, w2, b2 = make(1, 32, 16, 16, 16)    # HW = 256, T forced to 128
    ref = ca_layer_ref(x, w1, b1, w2, b2)
    out3 = jax.block_until_ready(
        ca_layer(x, w1, b1, w2, b2, single_pass=False, hw_tile=128))
    assert jnp.allclose(out3, ref, atol=1e-5, rtol=1e-5), "two-pass (tiled) mismatch"

    print("KERNEL_OK")
</pallas_src>

<mosaic_0001>
module attributes {stable_mosaic.version = 11 : i64} {
  func.func @_fused_kernel(%arg0: i32, %arg1: memref<1x64x64xf32, #tpu.memory_space<vmem>>, %arg2: memref<64x4xf32, #tpu.memory_space<vmem>>, %arg3: memref<1x4xf32, #tpu.memory_space<vmem>>, %arg4: memref<64x4xf32, #tpu.memory_space<vmem>>, %arg5: memref<64x1xf32, #tpu.memory_space<vmem>>, %arg6: memref<1x64x64xf32, #tpu.memory_space<vmem>>) attributes {dimension_semantics = [#tpu.dimension_semantics<parallel>], iteration_bounds = array<i64: 2>, scalar_prefetch = 0 : i64, scratch_operands = 0 : i64, tpu.core_type = #tpu.core_type<tc>, window_params = [{transform_indices = @transform_0, window_bounds = array<i64: 1, 64, 64>}, {pipeline_mode = #tpu.pipeline_mode<synchronous>, transform_indices = @transform_1, window_bounds = array<i64: 64, 4>}, {pipeline_mode = #tpu.pipeline_mode<synchronous>, transform_indices = @transform_2, window_bounds = array<i64: 1, 4>}, {pipeline_mode = #tpu.pipeline_mode<synchronous>, transform_indices = @transform_3, window_bounds = array<i64: 64, 4>}, {pipeline_mode = #tpu.pipeline_mode<synchronous>, transform_indices = @transform_4, window_bounds = array<i64: 64, 1>}, {transform_indices = @transform_5, window_bounds = array<i64: 1, 64, 64>}]} {
    %c0 = arith.constant 0 : index
    %c0_0 = arith.constant 0 : index
    %c0_1 = arith.constant 0 : index
    %0 = vector.load %arg1[%c0, %c0_0, %c0_1] : memref<1x64x64xf32, #tpu.memory_space<vmem>>, vector<1x64x64xf32>
    %1 = vector.shape_cast %0 : vector<1x64x64xf32> to vector<64x64xf32>
    %cst = arith.constant dense<0.000000e+00> : vector<64xf32>
    %2 = vector.multi_reduction <add>, %1, %cst [1] : vector<64x64xf32> to vector<64xf32>
    %3 = vector.shape_cast %2 : vector<64xf32> to vector<64x1xf32>
    %c0_2 = arith.constant 0 : index
    %c0_3 = arith.constant 0 : index
    %4 = vector.load %arg2[%c0_2, %c0_3] : memref<64x4xf32, #tpu.memory_space<vmem>>, vector<64x4xf32>
    %5 = vector.broadcast %3 : vector<64x1xf32> to vector<64x4xf32>
    %6 = arith.mulf %4, %5 : vector<64x4xf32>
    %cst_4 = arith.constant dense<0.000000e+00> : vector<4xf32>
    %7 = vector.multi_reduction <add>, %6, %cst_4 [0] : vector<64x4xf32> to vector<4xf32>
    %8 = vector.shape_cast %7 : vector<4xf32> to vector<1x4xf32>
    %c0_5 = arith.constant 0 : index
    %c0_6 = arith.constant 0 : index
    %9 = vector.load %arg3[%c0_5, %c0_6] : memref<1x4xf32, #tpu.memory_space<vmem>>, vector<1x4xf32>
    %10 = arith.addf %8, %9 : vector<1x4xf32>
    %cst_7 = arith.constant 0.000000e+00 : f32
    %11 = vector.broadcast %cst_7 : f32 to vector<1x4xf32>
    %12 = arith.maximumf %10, %11 : vector<1x4xf32>
    %c0_8 = arith.constant 0 : index
    %c0_9 = arith.constant 0 : index
    %13 = vector.load %arg4[%c0_8, %c0_9] : memref<64x4xf32, #tpu.memory_space<vmem>>, vector<64x4xf32>
    %14 = vector.broadcast %12 : vector<1x4xf32> to vector<64x4xf32>
    %15 = arith.mulf %13, %14 : vector<64x4xf32>
    %cst_10 = arith.constant dense<0.000000e+00> : vector<64xf32>
    %16 = vector.multi_reduction <add>, %15, %cst_10 [1] : vector<64x4xf32> to vector<64xf32>
    %17 = vector.shape_cast %16 : vector<64xf32> to vector<64x1xf32>
    %c0_11 = arith.constant 0 : index
    %c0_12 = arith.constant 0 : index
    %18 = vector.load %arg5[%c0_11, %c0_12] : memref<64x1xf32, #tpu.memory_space<vmem>>, vector<64x1xf32>
    %19 = arith.addf %17, %18 : vector<64x1xf32>
    %20 = arith.negf %19 : vector<64x1xf32>
    %21 = math.exp %20 : vector<64x1xf32>
    %cst_13 = arith.constant 1.000000e+00 : f32
    %22 = vector.broadcast %cst_13 : f32 to vector<64x1xf32>
    %23 = arith.addf %22, %21 : vector<64x1xf32>
    %24 = arith.divf %22, %23 : vector<64x1xf32>
    %25 = vector.broadcast %24 : vector<64x1xf32> to vector<64x64xf32>
    %26 = arith.mulf %1, %25 : vector<64x64xf32>
    %c0_14 = arith.constant 0 : index
    %c0_15 = arith.constant 0 : index
    %c0_16 = arith.constant 0 : index
    %27 = vector.load %arg6[%c0_14, %c0_15, %c0_16] : memref<1x64x64xf32, #tpu.memory_space<vmem>>, vector<1x64x64xf32>
    %28 = vector.shape_cast %27 : vector<1x64x64xf32> to vector<64x64xf32>
    %29 = vector.shape_cast %26 : vector<64x64xf32> to vector<1x64x64xf32>
    tpu.vector_store %arg6[%c0_14, %c0_15, %c0_16], %29 {strides = array<i32>} : memref<1x64x64xf32, #tpu.memory_space<vmem>>, vector<1x64x64xf32>,
    return
  }
  func.func @transform_0(%arg0: i32) -> (i32, i32, i32) {
    %c0_i32 = arith.constant 0 : i32
    %c0_i32_0 = arith.constant 0 : i32
    %c0_i32_1 = arith.constant 0 : i32
    return %arg0, %c0_i32, %c0_i32_0 : i32, i32, i32
  }
  func.func @transform_1(%arg0: i32) -> (i32, i32) {
    %c0_i32 = arith.constant 0 : i32
    %c0_i32_0 = arith.constant 0 : i32
    %c0_i32_1 = arith.constant 0 : i32
    return %c0_i32, %c0_i32_0 : i32, i32
  }
  func.func @transform_2(%arg0: i32) -> (i32, i32) {
    %c0_i32 = arith.constant 0 : i32
    %c0_i32_0 = arith.constant 0 : i32
    %c0_i32_1 = arith.constant 0 : i32
    return %c0_i32, %c0_i32_0 : i32, i32
  }
  func.func @transform_3(%arg0: i32) -> (i32, i32) {
    %c0_i32 = arith.constant 0 : i32
    %c0_i32_0 = arith.constant 0 : i32
    %c0_i32_1 = arith.constant 0 : i32
    return %c0_i32, %c0_i32_0 : i32, i32
  }
  func.func @transform_4(%arg0: i32) -> (i32, i32) {
    %c0_i32 = arith.constant 0 : i32
    %c0_i32_0 = arith.constant 0 : i32
    %c0_i32_1 = arith.constant 0 : i32
    return %c0_i32, %c0_i32_0 : i32, i32
  }
  func.func @transform_5(%arg0: i32) -> (i32, i32, i32) {
    %c0_i32 = arith.constant 0 : i32
    %c0_i32_0 = arith.constant 0 : i32
    %c0_i32_1 = arith.constant 0 : i32
    return %arg0, %c0_i32, %c0_i32_0 : i32, i32, i32
  }
}

</mosaic_0001>

<bundles_post_ra>
// kernel: tpu_custom_call.1
= control target key start
LH: loop header
LB: loop body
LE: loop exit
PB: predicated region body
PF: predicated region fallthrough
CT: control target
= control target key end

     0   :  { %10 = vsyncpa [#allocation3], 0  ;;  %s976_s0 = inlined_call_operand.vmem [shape: f32[2,64,64], index: 0, kind: input, shape index: {}]   ;;  %s977_s1 = inlined_call_operand.vmem [shape: f32[64,4], index: 1, kind: input, shape index: {}]   ;;  %s978_s2 = inlined_call_operand.vmem [shape: f32[1,4], index: 2, kind: input, shape index: {}]   ;;  %s979_s3 = inlined_call_operand.vmem [shape: f32[64,4], index: 3, kind: input, shape index: {}]   ;;  %s980_s4 = inlined_call_operand.vmem [shape: f32[64,1], index: 4, kind: input, shape index: {}]   ;;  %s981_s5 = inlined_call_operand.hbm [shape: f32[2,64,64], index: 5, kind: output, shape index: {}]  }
   0x1   :  { %12 = vsyncpa [#allocation3 + $0x1], 0  ;;  %s731_s18 = smov 0   ;;  %s733_s19 = smov 0  }
   0x2   :  { %s735_s20 = smov 0   ;;  %s737_s21 = smov 0  }
   0x3 LB: > { %s752_s22 = sadd.s32 4294967295, %s695_s21   ;;  %s537_s23 = sadd.s32 4294967294, %s695_s21   ;;  %s695_s21 = sphi %s737_s21, %s987_s21   ;;  %s691_s20 = sphi %s735_s20, %s986_s20   ;;  %s687_s19 = sphi %s733_s19, %s985_s19   ;;  %s683_s18 = sphi %s731_s18, %s984_s18  }
   0x4   : > { %s756_s24 = sadd.s32 1, %s695_s21   ;;  %s135_s25 = sadd.s32 1, %s691_s20 }
   0x5   : > { %s132_s26 = ssub.s32 %s695_s21, %s756_s24  ;;  %p145_p0 = scmp.ne.s32.totalorder %s691_s20, %s687_s19 }
   0x6   : > { %p133_p1 = scmp.eq.s32.totalorder %s132_s26, 0  ;;  %p146_p2 = scmp.eq.s32.totalorder %s752_s22, 1 }
   0x7   : > { %p151_p3 = scmp.ne.s32.totalorder %s687_s19, %s683_s18  ;;  %p152_p4 = scmp.eq.s32.totalorder %s537_s23, 1 }
   0x8   : > { %s767_s27 = scalar_select %p133_p1, %s691_s20, %s135_s25  }
   0x9   : > { %p769_p5 = por %p146_p2, %p145_p0  ;;  %p773_p6 = por %p152_p4, %p151_p3 }
   0xa   : > { %p540_p7 = scmp.ge.s32.totalorder %s695_s21, 1  ;;  %p190_p8 = scmp.lt.s32.totalorder %s695_s21, 3 }
   0xc   : > { %p191_p9 = pnand %p540_p7, %p190_p8 }
   0xd   : > { %p218_p10 = scmp.lt.s32.totalorder (!%p191_p9), %s752_s22, 1  ;;  %s215_s12 = sand.u32 (!%p191_p9), 1, %s687_s19  }
   0xe   : > { %194 = sbr.rel (%p191_p9) target bundleno = 542 (0x21e), region = 40  ;;  %s541_s13 = sshll.u32 (!%p191_p9), %s215_s12, 6 }
   0xf   : > { %s217_s14 = scalar_lea.vmem (!%p191_p9), [#allocation2], %s541_s13  ;;  %s558_s15 = sshll.u32 (!%p191_p9), %s752_s22, 10 }
  0x10   : > { %s475_s16 = sshll.u32 (!%p191_p9), %s217_s14, 4  ;;  %s928_s25 = scalar_lea.hbm (!%p191_p9), %s981_s5, %s558_s15  ;;  %s930_s16 = int_to_ptr.vmem [resolvable:$true] %s475_s16 }
  0x11   : > { %s635_s26 = scalar_lea.vmem (!%p191_p9), %s930_s16, 1024 }
  0x12   : > { %p636_p11 = scmp.ne.s32.totalorder (!%p191_p9), %s930_s16, %s635_s26 }
  0x13   : > { %s219_s30 = scalar_select %p218_p10, %s752_s22, 1  ;;  %vm231_vm0 = vcmask 523264   ;;  %v256_v16 = vld [vmem:[%s977_s1] sm:$0xff]  ;;  %v258_v19 = vld [vmem:[%s977_s1 + $0x10] sm:$0xff]  ;;  %v257_v20 = vld [vmem:[%s977_s1 + $0x8] sm:$0xff]  ;;  %vm272_vm1 = vcmask 31744   ;;  %v305_v57 = vlaneseq }
  0x14   : > { %v259_v21 = vld [vmem:[%s977_s1 + $0x18] sm:$0xff]  ;;  %v260_v28 = vld [vmem:[%s977_s1 + $0x20] sm:$0xff]  ;;  %v261_v29 = vld [vmem:[%s977_s1 + $0x28] sm:$0xff]  ;;  %s936_s22 = scalar_lea.sflag [#allocation3], %s215_s12  ;;  %p637_p12 = pnand %p636_p11, %p769_p5 }
  0x15   : > { %s557_s6 = sshll.u32 %s219_s30, 6  ;;  %v262_v40 = vld [vmem:[%s977_s1 + $0x30] sm:$0xff]  ;;  %v263_v41 = vld [vmem:[%s977_s1 + $0x38] sm:$0xff]  ;;  %v306_v60 = vshrl.u32 %v305_v57, 7  ;;  %v294_v62 = vld [vmem:[%s978_s2] sm:$0x1] }
  0x16   : > { %s222_s9 = scalar_lea.vmem %s976_s0, %s557_s6  ;;  %p638_p13 = pneg %p637_p12 }
  0x17   : > { %v784_v0 = vld [vmem:[%s222_s9] sm:$0xff]  ;;  %v786_v1 = vld [vmem:[%s222_s9 + $0x10] sm:$0xff]  ;;  %v788_v2 = vld [vmem:[%s222_s9 + $0x8] sm:$0xff]  ;;  %s698_s30 = smov [#allocation2]  }
  0x18   : > { %v232_v3 = vsel %vm231_vm0, %v784_v0, 0.0  ;;  %v238_v4 = vsel %vm231_vm0, %v786_v1, 0.0  ;;  %v794_v5 = vld [vmem:[%s222_s9 + $0x18] sm:$0xff]  ;;  %v235_v6 = vsel %vm231_vm0, %v788_v2, 0.0  ;;  %v800_v8 = vld [vmem:[%s222_s9 + $0x20] sm:$0xff]  ;;  %v802_v9 = vld [vmem:[%s222_s9 + $0x28] sm:$0xff] }
  0x19   : > { %233 = vadd.xlane.f32.xlu0 %v232_v3  ;;  %239 = vadd.xlane.f32.xlu1 %v238_v4  ;;  %v241_v7 = vsel %vm231_vm0, %v794_v5, 0.0  ;;  %v244_v10 = vsel %vm231_vm0, %v800_v8, 0.0  ;;  %v247_v11 = vsel %vm231_vm0, %v802_v9, 0.0  ;;  %v808_v12 = vld [vmem:[%s222_s9 + $0x30] sm:$0xff]  ;;  %v810_v13 = vld [vmem:[%s222_s9 + $0x38] sm:$0xff]  ;;  %v307_v3 = vsub.s32 0, %v306_v60 }
  0x1a   : > { %v250_v14 = vsel %vm231_vm0, %v808_v12, 0.0  ;;  %v253_v15 = vsel %vm231_vm0, %v810_v13, 0.0  ;;  %s639_s6 = sshll.u32 %s698_s30, 4  ;;  %s640_s6 = int_to_ptr.vmem [resolvable:$false] %s639_s6 }
  0x1b   : > { %s641_s7 = scalar_lea.vmem %s640_s6, 2048  ;;  %p642_p0 = scmp.lt.s32.totalorder %s930_s16, %s640_s6 }
  0x1c   : > { %p643_p1 = scmp.lt.s32.totalorder %s641_s7, %s635_s26 }
  0x1d   : > { %236 = vadd.xlane.f32.xlu0 %v235_v6  ;;  %242 = vadd.xlane.f32.xlu1 %v241_v7  ;;  %v298_v7 = vld [vmem:[%s979_s3 + $0x8] sm:$0xff] }
  0x1e   : > { %p644_p2 = por %p643_p1, %p642_p0 }
  0x20   : > { %p645_p3 = pnand %p644_p2, %p638_p13 }
  0x21   : > { %245 = vadd.xlane.f32.xlu0 %v244_v10  ;;  %248 = vadd.xlane.f32.xlu1 %v247_v11  ;;  %v297_v10 = vld [vmem:[%s979_s3] sm:$0xff] }
  0x25   : > { %251 = vadd.xlane.f32.xlu0 %v250_v14  ;;  %254 = vadd.xlane.f32.xlu1 %v253_v15  ;;  %v300_v14 = vld [vmem:[%s979_s3 + $0x18] sm:$0xff]  ;;  %v299_v15 = vld [vmem:[%s979_s3 + $0x10] sm:$0xff] }
  0xa2   : > { %v234_v17 = vpop.xlane.xlu0 %233  ;;  %v240_v18 = vpop.xlane.xlu1 %239 }
  0xa3   : > { %v264_v22 = vmul.f32 %v256_v16, %v234_v17  ;;  %v266_v25 = vmul.f32 %v258_v19, %v240_v18 }
  0xa5   : > { %v273_v30 = vsel %vm272_vm1, %v264_v22, 0.0  ;;  %v276_v35 = vsel %vm272_vm1, %v266_v25, 0.0  ;;  %v302_v22 = vld [vmem:[%s979_s3 + $0x28] sm:$0xff] }
  0xa6   : > { %v237_v23 = vpop.xlane.xlu0 %236  ;;  %v243_v24 = vpop.xlane.xlu1 %242 }
  0xa7   : > { %v265_v26 = vmul.f32 %v257_v20, %v237_v23  ;;  %v267_v27 = vmul.f32 %v259_v21, %v243_v24  ;;  %v301_v23 = vld [vmem:[%s979_s3 + $0x20] sm:$0xff] }
  0xa9   : > { %v274_v31 = vsel %vm272_vm1, %v265_v26, 0.0  ;;  %v278_v36 = vsel %vm272_vm1, %v267_v27, 0.0 }
  0xaa   : > { %v275_v32 = vadd.f32 %v274_v31, %v273_v30  ;;  %v246_v33 = vpop.xlane.xlu0 %245  ;;  %v249_v34 = vpop.xlane.xlu1 %248 }
  0xab   : > { %v268_v37 = vmul.f32 %v260_v28, %v246_v33  ;;  %v269_v38 = vmul.f32 %v261_v29, %v249_v34  ;;  %v304_v28 = vld [vmem:[%s979_s3 + $0x38] sm:$0xff]  ;;  %v303_v29 = vld [vmem:[%s979_s3 + $0x30] sm:$0xff] }
  0xac   : > { %v277_v39 = vadd.f32 %v276_v35, %v275_v32 }
  0xad   : > { %v280_v42 = vsel %vm272_vm1, %v268_v37, 0.0  ;;  %v282_v46 = vsel %vm272_vm1, %v269_v38, 0.0  ;;  %v342_v37 = vld [vmem:[%s980_s4 + $0x8] sm:$0xff]  ;;  %v341_v38 = vld [vmem:[%s980_s4] sm:$0xff] }
  0xae   : > { %v279_v43 = vadd.f32 %v278_v36, %v277_v39  ;;  %v252_v44 = vpop.xlane.xlu0 %251  ;;  %v255_v45 = vpop.xlane.xlu1 %254  ;;  %v697_v36 = vmov 0  }
  0xaf   : > { %v270_v47 = vmul.f32 %v262_v40, %v252_v44  ;;  %v271_v48 = vmul.f32 %v263_v41, %v255_v45  ;;  %602 = vset.pattern.permute.xlu1 %v697_v36  ;;  %601 = vset.pattern.permute.xlu0 %v697_v36  ;;  %v343_v44 = vld [vmem:[%s980_s4 + $0x10] sm:$0xff] }
  0xb0   : > { %v281_v49 = vadd.f32 %v280_v42, %v279_v43  ;;  %v344_v43 = vld [vmem:[%s980_s4 + $0x18] sm:$0xff] }
  0xb1   : > { %v284_v50 = vsel %vm272_vm1, %v270_v47, 0.0  ;;  %v286_v52 = vsel %vm272_vm1, %v271_v48, 0.0 }
  0xb2   : > { %v283_v51 = vadd.f32 %v282_v46, %v281_v49 }
  0xb4   : > { %v285_v53 = vadd.f32 %v284_v50, %v283_v51  ;;  %v345_v51 = vld [vmem:[%s980_s4 + $0x20] sm:$0xff] }
  0xb6   : > { %v287_v54 = vadd.f32 %v286_v52, %v285_v53 }
  0xb8   : > { %v288_v55 = vrot.slane %v287_v54, 4 }
  0xba   : > { %v289_v56 = vadd.f32 %v288_v55, %v287_v54  ;;  %v346_v54 = vld [vmem:[%s980_s4 + $0x28] sm:$0xff] }
  0xbc   : > { %v290_v58 = vrot.slane %v289_v56, 2 }
  0xbe   : > { %v291_v59 = vadd.f32 %v290_v58, %v289_v56 }
  0xc0   : > { %v292_v61 = vrot.slane %v291_v59, 1 }
  0xc2   : > { %v293_v63 = vadd.f32 %v292_v61, %v291_v59  ;;  %v347_v59 = vld [vmem:[%s980_s4 + $0x30] sm:$0xff] }
  0xc4   : > { %v295_v4 = vadd.f32 %v294_v62, %v293_v63 }
  0xc6   : > { %v296_v6 = vmax.f32 %v295_v4, 0.0 }
  0xc8   : > { %v308_v11 = vrot.slane %v296_v6, %v307_v3  ;;  %v348_v3 = vld [vmem:[%s980_s4 + $0x38] sm:$0xff] }
  0xca   : > { %v310_v16 = vmul.f32 %v308_v11, %v298_v7  ;;  %v309_v17 = vmul.f32 %v308_v11, %v297_v10  ;;  %v312_v20 = vmul.f32 %v308_v11, %v300_v14  ;;  %v311_v21 = vmul.f32 %v308_v11, %v299_v15 }
  0xcb   : > { %v314_v26 = vmul.f32 %v308_v11, %v302_v22  ;;  %v313_v27 = vmul.f32 %v308_v11, %v301_v23  ;;  %v316_v32 = vmul.f32 %v308_v11, %v304_v28  ;;  %v315_v33 = vmul.f32 %v308_v11, %v303_v29 }
  0xcc   : > { %v320_v18 = vsel %vm272_vm1, %v310_v16, 0.0  ;;  %v317_v19 = vsel %vm272_vm1, %v309_v17, 0.0  ;;  %v326_v24 = vsel %vm272_vm1, %v312_v20, 0.0  ;;  %v323_v25 = vsel %vm272_vm1, %v311_v21, 0.0 }
  0xcd   : > { %321 = vadd.xlane.f32.xlu1 %v320_v18  ;;  %318 = vadd.xlane.f32.xlu0 %v317_v19  ;;  %v332_v30 = vsel %vm272_vm1, %v314_v26, 0.0  ;;  %v329_v31 = vsel %vm272_vm1, %v313_v27, 0.0  ;;  %v338_v34 = vsel %vm272_vm1, %v316_v32, 0.0  ;;  %v335_v35 = vsel %vm272_vm1, %v315_v33, 0.0 }
  0xd1   : > { %327 = vadd.xlane.f32.xlu1 %v326_v24  ;;  %324 = vadd.xlane.f32.xlu0 %v323_v25 }
  0xd5   : > { %333 = vadd.xlane.f32.xlu1 %v332_v30  ;;  %330 = vadd.xlane.f32.xlu0 %v329_v31 }
  0xd9   : > { %339 = vadd.xlane.f32.xlu1 %v338_v34  ;;  %336 = vadd.xlane.f32.xlu0 %v335_v35 }
 0x156   : > { %v322_v39 = vpop.xlane.xlu1 %321  ;;  %v319_v40 = vpop.xlane.xlu0 %318 }
 0x157   : > { %v350_v41 = vadd.f32 %v342_v37, %v322_v39  ;;  %v349_v42 = vadd.f32 %v341_v38, %v319_v40 }
 0x159   : > { %v545_v45 = vmul.f32 -1.442695, %v350_v41  ;;  %v544_v46 = vmul.f32 -1.442695, %v349_v42 }
 0x15a   : > { %v328_v47 = vpop.xlane.xlu1 %327  ;;  %v325_v48 = vpop.xlane.xlu0 %324 }
 0x15b   : > { %603 = vpow2.f32 %v545_v45  ;;  %v352_v49 = vadd.f32 %v344_v43, %v328_v47  ;;  %v351_v50 = vadd.f32 %v343_v44, %v325_v48 }
 0x15c   : > { %605 = vpow2.f32 %v544_v46 }
 0x15d   : > { %v547_v52 = vmul.f32 -1.442695, %v352_v49  ;;  %v546_v53 = vmul.f32 -1.442695, %v351_v50 }
 0x15e   : > { %v334_v55 = vpop.xlane.xlu1 %333  ;;  %v331_v56 = vpop.xlane.xlu0 %330 }
 0x15f   : > { %607 = vpow2.f32 %v547_v52  ;;  %v353_v57 = vadd.f32 %v345_v51, %v331_v56  ;;  %v354_v58 = vadd.f32 %v346_v54, %v334_v55 }
 0x160   : > { %609 = vpow2.f32 %v546_v53 }
 0x161   : > { %v548_v60 = vmul.f32 -1.442695, %v353_v57  ;;  %v549_v63 = vmul.f32 -1.442695, %v354_v58 }
 0x162   : > { %v337_v61 = vpop.xlane.xlu0 %336  ;;  %v340_v4 = vpop.xlane.xlu1 %339 }
 0x163   : > { %v355_v62 = vadd.f32 %v347_v59, %v337_v61  ;;  %611 = vpow2.f32 %v548_v60  ;;  %v356_v7 = vadd.f32 %v348_v3, %v340_v4 }
 0x164   : > { %613 = vpow2.f32 %v549_v63 }
 0x165   : > { %v550_v6 = vmul.f32 -1.442695, %v355_v62  ;;  %v551_v16 = vmul.f32 -1.442695, %v356_v7 }
 0x167   : > { %615 = vpow2.f32 %v550_v6 }
 0x168   : > { %v604_v10 = vpop.eup %603 }
 0x169   : > { %v606_v11 = vpop.eup %605  ;;  %v382_v14 = vadd.f32 1.0, %v604_v10 }
 0x16a   : > { %v381_v15 = vadd.f32 1.0, %v606_v11 }
 0x16b   : > { %617 = vrcp.f32 %v382_v14 }
 0x16c   : > { %v608_v17 = vpop.eup %607  ;;  %619 = vrcp.f32 %v381_v15 }
 0x16d   : > { %v610_v18 = vpop.eup %609  ;;  %621 = vpow2.f32 %v551_v16  ;;  %v384_v20 = vadd.f32 1.0, %v608_v17 }
 0x16e   : > { %v383_v19 = vadd.f32 1.0, %v610_v18 }
 0x170   : > { %623 = vrcp.f32 %v383_v19  ;;  %v612_v21 = vpop.eup %611 }
 0x171   : > { %625 = vrcp.f32 %v384_v20  ;;  %v385_v22 = vadd.f32 1.0, %v612_v21  ;;  %v614_v23 = vpop.eup %613 }
 0x172   : > { %v386_v26 = vadd.f32 1.0, %v614_v23 }
 0x173   : > { %627 = vrcp.f32 %v385_v22 }
 0x174   : > { %v616_v24 = vpop.eup %615  ;;  %629 = vrcp.f32 %v386_v26 }
 0x175   : > { %v387_v29 = vadd.f32 1.0, %v616_v24 }
 0x177   : > { %631 = vrcp.f32 %v387_v29 }
 0x178   : > { %v618_v25 = vpop.eup %617 }
 0x179   : > { %v620_v27 = vpop.eup %619  ;;  %412 = vperm.xlu1 %602, %v618_v25  }
 0x17a   : > { %407 = vperm.xlu0 %601, %v620_v27   ;;  %v622_v28 = vpop.eup %621 }
 0x17b   : > { %v388_v31 = vadd.f32 1.0, %v622_v28 }
 0x17d   : > { %v624_v30 = vpop.eup %623  ;;  %633 = vrcp.f32 %v388_v31 }
 0x17e   : > { %417 = vperm.xlu1 %602, %v624_v30   ;;  %v626_v32 = vpop.eup %625 }
 0x180   : > { %v628_v33 = vpop.eup %627 }
 0x181   : > { %v630_v34 = vpop.eup %629 }
 0x182   : > { %422 = vperm.xlu1 %602, %v626_v32  }
 0x184   : > { %v632_v35 = vpop.eup %631 }
 0x186   : > { %427 = vperm.xlu1 %602, %v628_v33  }
 0x18a   : > { %432 = vperm.xlu1 %602, %v630_v34   ;;  %v634_v36 = vpop.eup %633 }
 0x18e   : > { %437 = vperm.xlu1 %602, %v632_v35  }
 0x192   : > { %442 = vperm.xlu1 %602, %v634_v36  }
 0x1f4   : > { %v413_v37 = vpop.permute.xlu1 %412 }
 0x1f5   : > { %v446_v38 = vmul.f32 %v413_v37, %v788_v2  ;;  %v408_v39 = vpop.permute.xlu0 %407 }
 0x1f6   : > { %v445_v40 = vmul.f32 %v408_v39, %v784_v0 }
 0x1f7   : > { %454 = vst.msk [vmem:[%s217_s14 + $0x8] sm:$0xff] %vm231_vm0, %v446_v38 }
 0x1f8   : > { %453 = vst.msk [vmem:[%s217_s14] sm:$0xff] %vm231_vm0, %v445_v40 }
 0x1f9   : > { %v418_v41 = vpop.permute.xlu1 %417 }
 0x1fa   : > { %v447_v42 = vmul.f32 %v418_v41, %v786_v1 }
 0x1fc   : > { %455 = vst.msk [vmem:[%s217_s14 + $0x10] sm:$0xff] %vm231_vm0, %v447_v42 }
 0x1fd   : > { %v423_v43 = vpop.permute.xlu1 %422 }
 0x1fe   : > { %v448_v44 = vmul.f32 %v423_v43, %v794_v5 }
 0x200   : > { %456 = vst.msk [vmem:[%s217_s14 + $0x18] sm:$0xff] %vm231_vm0, %v448_v44 }
 0x201   : > { %v428_v2 = vpop.permute.xlu1 %427 }
 0x202   : > { %v449_v0 = vmul.f32 %v428_v2, %v800_v8 }
 0x204   : > { %457 = vst.msk [vmem:[%s217_s14 + $0x20] sm:$0xff] %vm231_vm0, %v449_v0 }
 0x205   : > { %v433_v45 = vpop.permute.xlu1 %432 }
 0x206   : > { %v450_v46 = vmul.f32 %v433_v45, %v802_v9 }
 0x208   : > { %458 = vst.msk [vmem:[%s217_s14 + $0x28] sm:$0xff] %vm231_vm0, %v450_v46 }
 0x209   : > { %v438_v1 = vpop.permute.xlu1 %437 }
 0x20a   : > { %v451_v47 = vmul.f32 %v438_v1, %v808_v12 }
 0x20c   : > { %459 = vst.msk [vmem:[%s217_s14 + $0x30] sm:$0xff] %vm231_vm0, %v451_v47 }
 0x20d   : > { %v443_v5 = vpop.permute.xlu1 %442 }
 0x20e   : > { %v452_v8 = vmul.f32 %v443_v5, %v810_v13 }
 0x210   : > { %460 = vst.msk [vmem:[%s217_s14 + $0x38] sm:$0xff] %vm231_vm0, %v452_v8 }
 0x211   : > { %648 = shalt.err (!%p645_p3)
}
 0x212   : > { %s649_s8 = scalar_lea.hbm %s928_s25, 1024  ;;  %s653_s11 = scalar_lea.hbm %s981_s5, 2048 }
 0x213   : > { %p650_p4 = scmp.ne.s32.totalorder %s928_s25, %s649_s8  ;;  %p654_p9 = scmp.lt.s32.totalorder %s928_s25, %s981_s5 }
 0x214   : > { %p655_p10 = scmp.lt.s32.totalorder %s653_s11, %s649_s8 }
 0x215   : > { %p651_p7 = pnand %p650_p4, %p769_p5 }
 0x216   : > { %p656_p11 = por %p655_p10, %p654_p9 }
 0x217   : > { %p652_p8 = pneg %p651_p7 }
 0x219   : > { %p657_p12 = pnand %p656_p11, %p652_p8 }
 0x21b   : > { %660 = shalt.err (!%p657_p12)
}
 0x21c   : > { %s699_s14 = smov 128   ;;  %s700_s15 = smov 8  }
 0x21d   : > { %559 = dma.vmem_to_hbm [thread:$0]  (%p769_p5), %s930_s16, 1024, %s928_s25, %s936_s22, %s699_s14, %s699_s14, %s700_s15  }
 0x21e PF: > { %p565_p13 = scmp.ge.s32.totalorder %s695_s21, 2  ;;  %s490_s17 = sand.u32 1, %s683_s18  }
 0x21f   : > { %s491_s23 = scalar_lea.sflag [#allocation3], %s490_s17 }
 0x220   : > { %p562_p0 = pnand %p565_p13, %p773_p6 }
 0x222   : > { %p563_p1 = pneg %p562_p0 }
 0x224   : > { %678 = dma.done.wait (%p563_p1), %s491_s23, 1024  }
 0x225   : > { %680 = vsyncadd (%p563_p1), %s491_s23, 4294966272  ;;  %p15_p2 = scmp.ge.s32.totalorder %s756_s24, 4   ;;  %s984_s18 = smov %s687_s19 }
 0x226   : > { %s985_s19 = smov %s691_s20  ;;  %s986_s20 = smov %s767_s27 }
 0x227   : > { %s987_s21 = smov %s756_s24  ;;  %17 = sbr.rel (!%p15_p2) target bundleno = 3 (0x3), region = 75 }
 0x22c   :  { %496 = vsyncpa [#allocation3], 1 }
 0x22d   :  { %498 = vsyncpa [#allocation3 + $0x1], 1 }

</bundles_post_ra>
